<compile_context>
chip_gen: v5e
topology: v5e:2x2
jax: 0.10.0
libtpu: 0.0.40
codegen_flags: <defaults>
</compile_context>

<pallas_src>
import jax
import jax.numpy as jnp
from jax.experimental import pallas as pl
from jax.experimental.pallas import tpu as pltpu


_COL_CANDIDATES = (1024, 512, 256, 128)   # lane-dense widths (multiples of 128)
_TARGET_TILE_BYTES = 2 * 1024 * 1024      # ~2 MiB per tile per buffer
_ROW_ALIGN = 32                           # covers (8,128)/(16,128)/(32,128) packing


def _cdiv(a, b):
    return -(-a // b)


def _exp_kernel(x_ref, o_ref):
    # Whole-tile elementwise exp; lowers to the EUP transcendental unit.
    o_ref[...] = jnp.exp(x_ref[...])


def _pallas_exp_2d(x2d, tm):
    rows, cols = x2d.shape
    grid = (_cdiv(rows, tm),)
    return pl.pallas_call(
        _exp_kernel,
        out_shape=jax.ShapeDtypeStruct((rows, cols), x2d.dtype),
        grid=grid,
        in_specs=[pl.BlockSpec((tm, cols), lambda i: (i, 0))],
        out_specs=pl.BlockSpec((tm, cols), lambda i: (i, 0)),
        compiler_params=pltpu.CompilerParams(
            dimension_semantics=("parallel",),
        ),
    )(x2d)


def exp_layer(x, *, min_pallas_bytes=256 * 1024):
    """Elementwise exp. Matches jnp.exp(x) (TPU EUP exp; few-ULP vs CPU libm)."""
    orig_shape = x.shape
    n = x.size
    if n == 0:
        return jnp.exp(x)

    # torch.exp promotes integral inputs to floating point; mirror that.
    if not jnp.issubdtype(x.dtype, jnp.floating):
        x = x.astype(jnp.float32)

    itemsize = jnp.dtype(x.dtype).itemsize

    # Tiny tensors: custom-call launch + per-step overhead dominates; let XLA
    # fuse the exp into neighboring ops instead.
    if n * itemsize < min_pallas_bytes:
        return jnp.exp(x)

    # Pick the widest lane-dense column count that divides n exactly (no copy).
    cols = None
    for c in _COL_CANDIDATES:
        if n % c == 0:
            cols = c
            break

    flat = x.reshape(-1)
    pad = 0
    if cols is None:
        # Fallback for fully unaligned sizes: pad the flat array to a whole
        # number of 1024-wide rows (rare; bounded extra copy).
        cols = _COL_CANDIDATES[0]
        rows = _cdiv(n, cols)
        pad = rows * cols - n
        flat = jnp.pad(flat, (0, pad))
    else:
        rows = n // cols

    # dtype-aware tile height targeting ~2 MiB per tile, aligned for packing.
    tm = (_TARGET_TILE_BYTES // (cols * itemsize)) // _ROW_ALIGN * _ROW_ALIGN
    tm = max(_ROW_ALIGN, tm)
    if rows <= tm:
        # Single block covering the whole array (allowed for any row count).
        tm = rows

    out2d = _pallas_exp_2d(flat.reshape(rows, cols), tm)

    out = out2d.reshape(-1)
    if pad:
        out = out[:n]
    return out.reshape(orig_shape)


if __name__ == "__main__":
    key = jax.random.PRNGKey(0)

    # 1) Small NCHW demo tensor (batch=2, C=4, 16x16); force the Pallas path
    #    so the kernel itself is exercised even below the size threshold.
    #    n = 2048 -> cols=1024 divides exactly, single full-array block, no pad.
    x = jax.random.normal(key, (2, 4, 16, 16), dtype=jnp.float32)
    y = exp_layer(x, min_pallas_bytes=0)
    jax.block_until_ready(y)
    assert y.shape == x.shape and y.dtype == x.dtype
    assert jnp.allclose(y, jnp.exp(x), rtol=1e-6, atol=1e-6)

    # 2) Larger shape with ragged row count: n = 1,052,672 is divisible by 1024
    #    (no padding copy) but rows=1028 is not a multiple of the 512-row tile,
    #    exercising the ragged multi-tile grid and the parallel grid axis.
    x_big = jax.random.normal(jax.random.fold_in(key, 1),
                              (2, 8, 256, 257), dtype=jnp.float32)
    y_big = exp_layer(x_big)
    jax.block_until_ready(y_big)
    assert y_big.shape == x_big.shape and y_big.dtype == x_big.dtype
    assert jnp.allclose(y_big, jnp.exp(x_big), rtol=1e-6, atol=1e-6)

    # 3) Fully unaligned element count (702 elements): exercises the padded
    #    fallback path, forced through Pallas.
    x_odd = jax.random.normal(jax.random.fold_in(key, 2),
                              (2, 3, 9, 13), dtype=jnp.float32)
    y_odd = exp_layer(x_odd, min_pallas_bytes=0)
    jax.block_until_ready(y_odd)
    assert y_odd.shape == x_odd.shape and y_odd.dtype == x_odd.dtype
    assert jnp.allclose(y_odd, jnp.exp(x_odd), rtol=1e-6, atol=1e-6)

    print("KERNEL_OK")
</pallas_src>

<mosaic_0001>
module attributes {stable_mosaic.version = 11 : i64} {
  func.func @_exp_kernel(%arg0: i32, %arg1: memref<2x1024xf32, #tpu.memory_space<vmem>>, %arg2: memref<2x1024xf32, #tpu.memory_space<vmem>>) attributes {dimension_semantics = [#tpu.dimension_semantics<parallel>], iteration_bounds = array<i64: 1>, scalar_prefetch = 0 : i64, scratch_operands = 0 : i64, tpu.core_type = #tpu.core_type<tc>, window_params = [{transform_indices = @transform_0, window_bounds = array<i64: 2, 1024>}, {transform_indices = @transform_1, window_bounds = array<i64: 2, 1024>}]} {
    %c0 = arith.constant 0 : index
    %c0_0 = arith.constant 0 : index
    %0 = vector.load %arg1[%c0, %c0_0] : memref<2x1024xf32, #tpu.memory_space<vmem>>, vector<2x1024xf32>
    %1 = math.exp %0 : vector<2x1024xf32>
    %c0_1 = arith.constant 0 : index
    %c0_2 = arith.constant 0 : index
    %2 = vector.load %arg2[%c0_1, %c0_2] : memref<2x1024xf32, #tpu.memory_space<vmem>>, vector<2x1024xf32>
    tpu.vector_store %arg2[%c0_1, %c0_2], %1 {strides = array<i32>} : memref<2x1024xf32, #tpu.memory_space<vmem>>, vector<2x1024xf32>,
    return
  }
  func.func @transform_0(%arg0: i32) -> (i32, i32) {
    %c0_i32 = arith.constant 0 : i32
    %c0_i32_0 = arith.constant 0 : i32
    return %arg0, %c0_i32 : i32, i32
  }
  func.func @transform_1(%arg0: i32) -> (i32, i32) {
    %c0_i32 = arith.constant 0 : i32
    %c0_i32_0 = arith.constant 0 : i32
    return %arg0, %c0_i32 : i32, i32
  }
}

</mosaic_0001>

<bundles_post_ra>
// kernel: tpu_custom_call.1
= control target key start
LH: loop header
LB: loop body
LE: loop exit
PB: predicated region body
PF: predicated region fallthrough
CT: control target
= control target key end

     0   :  { %6 = vsyncpa [#allocation3], 0  ;;  %s124_s0 = inlined_call_operand.hbm [shape: f32[2,1024], index: 0, kind: input, shape index: {}]   ;;  %s125_s1 = inlined_call_operand.hbm [shape: f32[2,1024], index: 1, kind: output, shape index: {}]  }
   0x1   :  { %7 = vsyncpa [#allocation4], 0  ;;  %s13_s8 = sshll.u32 %s124_s0, 4  ;;  %s106_s9 = smov [#allocation2]   ;;  %s14_s8 = int_to_ptr.hbm [resolvable:$true] %s13_s8 }
   0x2   :  { %s15_s10 = sshll.u32 %s106_s9, 4  ;;  %s16_s10 = int_to_ptr.vmem [resolvable:$true] %s15_s10 }
   0x3   :  { %18 = dma.hbm_to_vmem [thread:$0]  %s14_s8, 256, %s16_s10, [#allocation3]  }
   0x4   :  { %102 = dma.done.wait [#allocation3], 256  }
   0x5   :  { %103 = vsyncadd [#allocation3], 4294967040  ;;  %v23_v0 = vld [vmem:[#allocation2] sm:$0xff]  ;;  %v24_v1 = vld [vmem:[#allocation2 + $0x8] sm:$0xff]  ;;  %s107_s11 = smov [#allocation5]   ;;  %s38_s15 = sshll.u32 %s125_s1, 4  ;;  %s39_s15 = int_to_ptr.hbm [resolvable:$true] %s38_s15 }
   0x6   :  { %v25_v2 = vmul.f32 1.442695, %v23_v0  ;;  %v27_v3 = vmul.f32 1.442695, %v24_v1  ;;  %s36_s12 = sshll.u32 %s107_s11, 4  ;;  %s37_s12 = int_to_ptr.vmem [resolvable:$true] %s36_s12 }
   0x8   :  { %50 = vpow2.f32 %v25_v2 }
   0x9   :  { %52 = vpow2.f32 %v27_v3 }
   0xe   :  { %v51_v4 = vpop.eup %50 }
   0xf   :  { %v53_v5 = vpop.eup %52  ;;  %29 = vst [vmem:[#allocation5] sm:$0xff] %v51_v4 }
  0x10   :  { %30 = vst [vmem:[#allocation5 + $0x8] sm:$0xff] %v53_v5 }
  0x11   :  { %41 = dma.vmem_to_hbm [thread:$0]  %s37_s12, 256, %s39_s15, [#allocation4]  }
  0x12   :  { %104 = dma.done.wait [#allocation4], 256  }
  0x13   :  { %105 = vsyncadd [#allocation4], 4294967040 }
  0x14   :  { %46 = vsyncpa [#allocation3], 1 }
  0x15   :  { %47 = vsyncpa [#allocation4], 1 }

</bundles_post_ra>
